<compile_context>
chip_gen: v5e
topology: v5e:2x2
jax: 0.10.0
libtpu: 0.0.40
codegen_flags: <defaults>
</compile_context>

<pallas_src>
import functools

import jax
import jax.numpy as jnp
from jax.experimental import pallas as pl


# ---------------------------------------------------------------------------
# Fused criterion kernel (single invocation, whole arrays as one VMEM block).
#   logits_ref : (R, L)    float  lane-dense view of all logits
#   aux_ref    : (16, NBp) f32    rows 0-3 src cxcywh, 4-7 tgt cxcywh,
#                                 row 8 matched logit x[b,q,label],
#                                 row 9 validity mask (1 real / 0 pad)
#   out_ref    : (8, 128)  f32    [0,0]=focal sum, [0,1]=L1 sum, [0,2]=sum(1-GIoU)
# ---------------------------------------------------------------------------
def _criterion_kernel(logits_ref, aux_ref, out_ref, *, alpha, gamma):
    if alpha >= 0:
        w_pos, w_neg = alpha, 1.0 - alpha
    else:
        w_pos, w_neg = 1.0, 1.0

    def mod(v):                      # (1 - p_t) ** gamma, avoid pow for gamma=2
        if gamma == 2.0:
            return v * v
        return v ** gamma

    # ---- bulk focal term: every element treated as a negative (t = 0) ------
    x = logits_ref[...].astype(jnp.float32)
    ax = jnp.abs(x)
    e = jnp.exp(-ax)                               # EUP
    lg = jnp.log1p(e)                              # EUP
    inv = 1.0 / (1.0 + e)                          # exact (approx would hurt rtol)
    pos = x >= 0.0
    sig = jnp.where(pos, inv, e * inv)             # sigmoid(x), stable
    ce_neg = jnp.where(pos, ax, 0.0) + lg          # log(1 + exp(x)), stable
    focal_bulk = jnp.sum(w_neg * ce_neg * mod(sig))

    # ---- matched-positive correction (tiny tile) ----------------------------
    aux = aux_ref[...].astype(jnp.float32)         # (16, NBp)
    xm = aux[8:9, :]                               # matched logits
    vm = aux[9:10, :]                              # validity mask
    axm = jnp.abs(xm)
    em = jnp.exp(-axm)
    lgm = jnp.log1p(em)
    invm = 1.0 / (1.0 + em)
    posm = xm >= 0.0
    sigm = jnp.where(posm, invm, em * invm)        # sigmoid(x)
    osigm = jnp.where(posm, em * invm, invm)       # 1 - sigmoid(x)
    ce_pos = jnp.where(posm, 0.0, axm) + lgm       # log(1 + exp(-x)), stable
    ce_negm = jnp.where(posm, axm, 0.0) + lgm
    f_pos = w_pos * ce_pos * mod(osigm)
    f_negm = w_neg * ce_negm * mod(sigm)
    focal_sum = focal_bulk + jnp.sum(vm * (f_pos - f_negm))

    # ---- matched-box L1 + GIoU sums (padded cols are identical unit boxes) --
    l1_sum = jnp.sum(jnp.abs(aux[0:4, :] - aux[4:8, :]))

    scx, scy, sw, sh = aux[0:1], aux[1:2], aux[2:3], aux[3:4]
    tcx, tcy, tw, th = aux[4:5], aux[5:6], aux[6:7], aux[7:8]
    ax1, ay1 = scx - 0.5 * sw, scy - 0.5 * sh
    ax2, ay2 = scx + 0.5 * sw, scy + 0.5 * sh
    bx1, by1 = tcx - 0.5 * tw, tcy - 0.5 * th
    bx2, by2 = tcx + 0.5 * tw, tcy + 0.5 * th
    area_a = (ax2 - ax1) * (ay2 - ay1)
    area_b = (bx2 - bx1) * (by2 - by1)
    iw = jnp.maximum(jnp.minimum(ax2, bx2) - jnp.maximum(ax1, bx1), 0.0)
    ih = jnp.maximum(jnp.minimum(ay2, by2) - jnp.maximum(ay1, by1), 0.0)
    inter = iw * ih
    union = area_a + area_b - inter
    iou = inter / union                            # direct divide, matches torch
    ew = jnp.maximum(ax2, bx2) - jnp.minimum(ax1, bx1)
    eh = jnp.maximum(ay2, by2) - jnp.minimum(ay1, by1)
    enc = ew * eh
    giou = iou - (enc - union) / enc
    giou_sum = jnp.sum(1.0 - giou)

    # ---- lane-dense (8, 128) output tile, single unmasked store -------------
    sub = jax.lax.broadcasted_iota(jnp.int32, (8, 128), 0)
    lane = jax.lax.broadcasted_iota(jnp.int32, (8, 128), 1)
    row0 = sub == 0
    vals = jnp.where(row0 & (lane == 0), focal_sum, 0.0)
    vals = jnp.where(row0 & (lane == 1), l1_sum, vals)
    vals = jnp.where(row0 & (lane == 2), giou_sum, vals)
    out_ref[...] = vals


def _criterion_sums(logits2d, aux, *, alpha, gamma):
    """Returns (focal_sum, l1_sum, giou_sum) from one fused, grid-less pallas_call."""
    out = pl.pallas_call(
        functools.partial(_criterion_kernel, alpha=alpha, gamma=gamma),
        out_shape=jax.ShapeDtypeStruct((8, 128), jnp.float32),
        in_specs=[
            pl.BlockSpec(logits2d.shape, lambda: (0, 0)),   # whole array, one block
            pl.BlockSpec(aux.shape, lambda: (0, 0)),
        ],
        out_specs=pl.BlockSpec((8, 128), lambda: (0, 0)),
    )(logits2d, aux)
    return out[0, 0], out[0, 1], out[0, 2]


# ---------------------------------------------------------------------------
# SetCriterion.forward equivalent (losses=['class','boxes'], focal_loss branch).
# ---------------------------------------------------------------------------
def set_criterion_forward(outputs, targets, num_classes, alpha=0.25, gamma=2.0):
    pred_logits = outputs["pred_logits"]   # (B, Q, C)
    pred_boxes = outputs["pred_boxes"]     # (B, Q, 4)
    B, Q, C = pred_logits.shape
    assert C == num_classes

    # TODO(synk): the Hungarian matcher (scipy linear_sum_assignment) is an
    # external module with no clean Pallas equivalent; use identity matching
    # (target j <-> query j) as the synthetic matcher.
    indices = [(jnp.arange(t["labels"].shape[0], dtype=jnp.int32),
                jnp.arange(t["labels"].shape[0], dtype=jnp.int32))
               for t in targets]

    # TODO(synk): distributed all_reduce of num_boxes across workers not modeled.
    num_boxes = float(sum(int(t["labels"].shape[0]) for t in targets))
    num_boxes = max(num_boxes, 1.0)

    batch_idx = jnp.concatenate(
        [jnp.full_like(src, i) for i, (src, _) in enumerate(indices)])
    src_idx = jnp.concatenate([src for src, _ in indices])
    target_classes_o = jnp.concatenate(
        [t["labels"][J] for t, (_, J) in zip(targets, indices)]).astype(jnp.int32)

    # Matched positive logits x[b, q, label] : tiny (NB,) gather, no one-hot.
    matched_logits = pred_logits[batch_idx, src_idx, target_classes_o].astype(jnp.float32)

    # Matched boxes (cxcywh).
    src_boxes = pred_boxes[batch_idx, src_idx].astype(jnp.float32)           # (NB, 4)
    target_boxes = jnp.concatenate(
        [t["boxes"][i] for t, (_, i) in zip(targets, indices)], axis=0).astype(jnp.float32)
    NB = src_boxes.shape[0]
    NBp = max(128, ((NB + 127) // 128) * 128)

    # Pad with identical unit boxes (zero L1 / zero 1-GIoU contribution) and a
    # validity mask for the focal correction row.
    dummy = jnp.tile(jnp.array([[0.5, 0.5, 1.0, 1.0]], jnp.float32), (NBp - NB, 1))
    src_p = jnp.concatenate([src_boxes, dummy], axis=0)                      # (NBp, 4)
    tgt_p = jnp.concatenate([target_boxes, dummy], axis=0)                   # (NBp, 4)
    mlog_p = jnp.concatenate([matched_logits, jnp.zeros((NBp - NB,), jnp.float32)])
    valid = jnp.concatenate([jnp.ones((NB,), jnp.float32),
                             jnp.zeros((NBp - NB,), jnp.float32)])
    aux = jnp.concatenate(
        [src_p.T, tgt_p.T, mlog_p[None, :], valid[None, :],
         jnp.zeros((6, NBp), jnp.float32)], axis=0)                          # (16, NBp)

    # Lane-dense view of the logits.  The bulk (negative-class) focal term is
    # label-independent, so any contiguous row-major relabelling is valid — a
    # free reshape, no padded HBM copy.
    total = B * Q * C
    if total % 128 == 0:
        logits2d = pred_logits.reshape(total // 128, 128)
    else:
        logits2d = pred_logits.reshape(B * Q, C)
    # TODO(synk): for very large B*Q*C (beyond VMEM) a row-blocked grid with an
    # accumulator would be needed; DETR-criterion sizes fit in one block.

    focal_sum, l1_sum, giou_sum = _criterion_sums(
        logits2d, aux, alpha=alpha, gamma=gamma)

    # sigmoid_focal_loss = loss.mean(1).sum() / num_boxes ; then * Q
    # == total_sum / num_boxes (algebraically identical).
    return {"loss_class": focal_sum / num_boxes,
            "loss_bbox": l1_sum / num_boxes,
            "loss_giou": giou_sum / num_boxes}
    # TODO(synk): 'ce_loss' / 'fed_loss' / 'oid_loss' branches and aux_outputs
    # need file-loaded class-frequency / hierarchy metadata and the external
    # matcher; only the default focal_loss branch is covered.


# ---------------------------------------------------------------------------
# Pure-JAX reference (mirrors the PyTorch formulas; validation only).
# ---------------------------------------------------------------------------
def _reference(outputs, targets, num_classes, alpha=0.25, gamma=2.0):
    pred_logits = outputs["pred_logits"]
    pred_boxes = outputs["pred_boxes"]
    B, Q, C = pred_logits.shape
    indices = [(jnp.arange(t["labels"].shape[0]), jnp.arange(t["labels"].shape[0]))
               for t in targets]
    num_boxes = max(float(sum(int(t["labels"].shape[0]) for t in targets)), 1.0)

    batch_idx = jnp.concatenate(
        [jnp.full_like(src, i) for i, (src, _) in enumerate(indices)])
    src_idx = jnp.concatenate([src for src, _ in indices])
    tco = jnp.concatenate([t["labels"][J] for t, (_, J) in zip(targets, indices)])
    tc = jnp.full((B, Q), num_classes, jnp.int32).at[batch_idx, src_idx].set(tco)
    onehot = jax.nn.one_hot(tc, num_classes + 1, dtype=jnp.float32)[:, :, :-1]

    x = pred_logits.astype(jnp.float32)
    prob = jax.nn.sigmoid(x)
    ce = jnp.maximum(x, 0.0) - x * onehot + jnp.log1p(jnp.exp(-jnp.abs(x)))
    p_t = prob * onehot + (1 - prob) * (1 - onehot)
    loss = (alpha * onehot + (1 - alpha) * (1 - onehot)) * ce * (1 - p_t) ** gamma
    loss_class = loss.mean(1).sum() / num_boxes * Q

    src_b = pred_boxes[batch_idx, src_idx].astype(jnp.float32)
    tgt_b = jnp.concatenate(
        [t["boxes"][i] for t, (_, i) in zip(targets, indices)], 0).astype(jnp.float32)
    loss_bbox = jnp.abs(src_b - tgt_b).sum() / num_boxes

    def to_xyxy(b):
        return jnp.stack([b[:, 0] - b[:, 2] / 2, b[:, 1] - b[:, 3] / 2,
                          b[:, 0] + b[:, 2] / 2, b[:, 1] + b[:, 3] / 2], -1)

    a, bb = to_xyxy(src_b), to_xyxy(tgt_b)
    area_a = (a[:, 2] - a[:, 0]) * (a[:, 3] - a[:, 1])
    area_b = (bb[:, 2] - bb[:, 0]) * (bb[:, 3] - bb[:, 1])
    inter = (jnp.clip(jnp.minimum(a[:, 2], bb[:, 2]) - jnp.maximum(a[:, 0], bb[:, 0]), 0) *
             jnp.clip(jnp.minimum(a[:, 3], bb[:, 3]) - jnp.maximum(a[:, 1], bb[:, 1]), 0))
    union = area_a + area_b - inter
    iou = inter / union
    enc = ((jnp.maximum(a[:, 2], bb[:, 2]) - jnp.minimum(a[:, 0], bb[:, 0])) *
           (jnp.maximum(a[:, 3], bb[:, 3]) - jnp.minimum(a[:, 1], bb[:, 1])))
    giou = iou - (enc - union) / enc
    loss_giou = (1 - giou).sum() / num_boxes
    return {"loss_class": loss_class, "loss_bbox": loss_bbox, "loss_giou": loss_giou}


if __name__ == "__main__":
    key = jax.random.PRNGKey(0)
    B, Q, C, T = 2, 8, 32, 3   # batch, queries, classes, targets per image
    k1, k2, k3, k4 = jax.random.split(key, 4)

    pred_logits = jax.random.normal(k1, (B, Q, C), jnp.float32)
    pred_boxes = jax.nn.sigmoid(jax.random.normal(k2, (B, Q, 4), jnp.float32))
    tgt_labels = jax.random.randint(k3, (B, T), 0, C, dtype=jnp.int32)
    tgt_boxes = jax.nn.sigmoid(jax.random.normal(k4, (B, T, 4), jnp.float32))

    outputs = {"pred_logits": pred_logits, "pred_boxes": pred_boxes}
    targets = [{"labels": tgt_labels[b], "boxes": tgt_boxes[b]} for b in range(B)]

    losses = set_criterion_forward(outputs, targets, num_classes=C)
    losses = {k: jax.block_until_ready(v) for k, v in losses.items()}

    ref = _reference(outputs, targets, num_classes=C)
    for k in losses:
        assert jnp.allclose(losses[k], ref[k], rtol=1e-4, atol=1e-5), (
            k, float(losses[k]), float(ref[k]))

    print("KERNEL_OK")
</pallas_src>

<mosaic_0001>
module attributes {stable_mosaic.version = 11 : i64} {
  func.func @_criterion_kernel(%arg0: memref<4x128xf32, #tpu.memory_space<vmem>>, %arg1: memref<16x128xf32, #tpu.memory_space<vmem>>, %arg2: memref<8x128xf32, #tpu.memory_space<vmem>>) attributes {dimension_semantics = [], scalar_prefetch = 0 : i64, scratch_operands = 0 : i64, tpu.core_type = #tpu.core_type<tc>} {
    %c0 = arith.constant 0 : index
    %c0_0 = arith.constant 0 : index
    %0 = vector.load %arg0[%c0, %c0_0] : memref<4x128xf32, #tpu.memory_space<vmem>>, vector<4x128xf32>
    %1 = math.absf %0 : vector<4x128xf32>
    %cst = arith.constant 0.000000e+00 : f32
    %2 = vector.broadcast %cst : f32 to vector<4x128xf32>
    %3 = arith.subf %2, %1 : vector<4x128xf32>
    %4 = math.exp %3 : vector<4x128xf32>
    %5 = math.log1p %4 : vector<4x128xf32>
    %cst_1 = arith.constant 1.000000e+00 : f32
    %6 = vector.broadcast %cst_1 : f32 to vector<4x128xf32>
    %7 = arith.addf %6, %4 : vector<4x128xf32>
    %cst_2 = arith.constant 1.000000e+00 : f32
    %8 = vector.broadcast %cst_2 : f32 to vector<4x128xf32>
    %9 = arith.divf %8, %7 : vector<4x128xf32>
    %cst_3 = arith.constant 0.000000e+00 : f32
    %10 = vector.broadcast %cst_3 : f32 to vector<4x128xf32>
    %11 = arith.cmpf oge, %0, %10 : vector<4x128xf32>
    %12 = arith.mulf %4, %9 : vector<4x128xf32>
    %13 = arith.select %11, %9, %12 : vector<4x128xi1>, vector<4x128xf32>
    %cst_4 = arith.constant 0.000000e+00 : f32
    %14 = vector.broadcast %cst_4 : f32 to vector<4x128xf32>
    %15 = arith.select %11, %1, %14 : vector<4x128xi1>, vector<4x128xf32>
    %16 = arith.addf %15, %5 : vector<4x128xf32>
    %cst_5 = arith.constant 7.500000e-01 : f32
    %17 = vector.broadcast %cst_5 : f32 to vector<4x128xf32>
    %18 = arith.mulf %17, %16 : vector<4x128xf32>
    %19 = arith.mulf %13, %13 : vector<4x128xf32>
    %20 = arith.mulf %18, %19 : vector<4x128xf32>
    %21 = vector.shape_cast %20 : vector<4x128xf32> to vector<1x4x128xf32>
    %cst_6 = arith.constant dense<0.000000e+00> : vector<1xf32>
    %22 = vector.multi_reduction <add>, %21, %cst_6 [1, 2] : vector<1x4x128xf32> to vector<1xf32>
    %23 = vector.shape_cast %22 : vector<1xf32> to vector<1x1x1xf32>
    %24 = vector.extract %23[0, 0, 0] : f32 from vector<1x1x1xf32>
    %c0_7 = arith.constant 0 : index
    %c0_8 = arith.constant 0 : index
    %25 = vector.load %arg1[%c0_7, %c0_8] : memref<16x128xf32, #tpu.memory_space<vmem>>, vector<16x128xf32>
    %26 = vector.extract_strided_slice %25 {offsets = [8, 0], sizes = [1, 128], strides = [1, 1]} : vector<16x128xf32> to vector<1x128xf32>
    %27 = vector.extract_strided_slice %25 {offsets = [9, 0], sizes = [1, 128], strides = [1, 1]} : vector<16x128xf32> to vector<1x128xf32>
    %28 = math.absf %26 : vector<1x128xf32>
    %cst_9 = arith.constant 0.000000e+00 : f32
    %29 = vector.broadcast %cst_9 : f32 to vector<1x128xf32>
    %30 = arith.subf %29, %28 : vector<1x128xf32>
    %31 = math.exp %30 : vector<1x128xf32>
    %32 = math.log1p %31 : vector<1x128xf32>
    %cst_10 = arith.constant 1.000000e+00 : f32
    %33 = vector.broadcast %cst_10 : f32 to vector<1x128xf32>
    %34 = arith.addf %33, %31 : vector<1x128xf32>
    %cst_11 = arith.constant 1.000000e+00 : f32
    %35 = vector.broadcast %cst_11 : f32 to vector<1x128xf32>
    %36 = arith.divf %35, %34 : vector<1x128xf32>
    %cst_12 = arith.constant 0.000000e+00 : f32
    %37 = vector.broadcast %cst_12 : f32 to vector<1x128xf32>
    %38 = arith.cmpf oge, %26, %37 : vector<1x128xf32>
    %39 = arith.mulf %31, %36 : vector<1x128xf32>
    %40 = arith.select %38, %36, %39 : vector<1x128xi1>, vector<1x128xf32>
    %41 = arith.mulf %31, %36 : vector<1x128xf32>
    %42 = arith.select %38, %41, %36 : vector<1x128xi1>, vector<1x128xf32>
    %cst_13 = arith.constant 0.000000e+00 : f32
    %43 = vector.broadcast %cst_13 : f32 to vector<1x128xf32>
    %44 = arith.select %38, %43, %28 : vector<1x128xi1>, vector<1x128xf32>
    %45 = arith.addf %44, %32 : vector<1x128xf32>
    %cst_14 = arith.constant 0.000000e+00 : f32
    %46 = vector.broadcast %cst_14 : f32 to vector<1x128xf32>
    %47 = arith.select %38, %28, %46 : vector<1x128xi1>, vector<1x128xf32>
    %48 = arith.addf %47, %32 : vector<1x128xf32>
    %cst_15 = arith.constant 2.500000e-01 : f32
    %49 = vector.broadcast %cst_15 : f32 to vector<1x128xf32>
    %50 = arith.mulf %49, %45 : vector<1x128xf32>
    %51 = arith.mulf %42, %42 : vector<1x128xf32>
    %52 = arith.mulf %50, %51 : vector<1x128xf32>
    %cst_16 = arith.constant 7.500000e-01 : f32
    %53 = vector.broadcast %cst_16 : f32 to vector<1x128xf32>
    %54 = arith.mulf %53, %48 : vector<1x128xf32>
    %55 = arith.mulf %40, %40 : vector<1x128xf32>
    %56 = arith.mulf %54, %55 : vector<1x128xf32>
    %57 = arith.subf %52, %56 : vector<1x128xf32>
    %58 = arith.mulf %27, %57 : vector<1x128xf32>
    %59 = vector.shape_cast %58 : vector<1x128xf32> to vector<1x1x128xf32>
    %cst_17 = arith.constant dense<0.000000e+00> : vector<1xf32>
    %60 = vector.multi_reduction <add>, %59, %cst_17 [1, 2] : vector<1x1x128xf32> to vector<1xf32>
    %61 = vector.shape_cast %60 : vector<1xf32> to vector<1x1x1xf32>
    %62 = vector.extract %61[0, 0, 0] : f32 from vector<1x1x1xf32>
    %63 = arith.addf %24, %62 : f32
    %64 = vector.extract_strided_slice %25 {offsets = [0, 0], sizes = [4, 128], strides = [1, 1]} : vector<16x128xf32> to vector<4x128xf32>
    %65 = vector.extract_strided_slice %25 {offsets = [4, 0], sizes = [4, 128], strides = [1, 1]} : vector<16x128xf32> to vector<4x128xf32>
    %66 = arith.subf %64, %65 : vector<4x128xf32>
    %67 = math.absf %66 : vector<4x128xf32>
    %68 = vector.shape_cast %67 : vector<4x128xf32> to vector<1x4x128xf32>
    %cst_18 = arith.constant dense<0.000000e+00> : vector<1xf32>
    %69 = vector.multi_reduction <add>, %68, %cst_18 [1, 2] : vector<1x4x128xf32> to vector<1xf32>
    %70 = vector.shape_cast %69 : vector<1xf32> to vector<1x1x1xf32>
    %71 = vector.extract %70[0, 0, 0] : f32 from vector<1x1x1xf32>
    %72 = vector.extract_strided_slice %25 {offsets = [0, 0], sizes = [1, 128], strides = [1, 1]} : vector<16x128xf32> to vector<1x128xf32>
    %73 = vector.extract_strided_slice %25 {offsets = [1, 0], sizes = [1, 128], strides = [1, 1]} : vector<16x128xf32> to vector<1x128xf32>
    %74 = vector.extract_strided_slice %25 {offsets = [2, 0], sizes = [1, 128], strides = [1, 1]} : vector<16x128xf32> to vector<1x128xf32>
    %75 = vector.extract_strided_slice %25 {offsets = [3, 0], sizes = [1, 128], strides = [1, 1]} : vector<16x128xf32> to vector<1x128xf32>
    %76 = vector.extract_strided_slice %25 {offsets = [4, 0], sizes = [1, 128], strides = [1, 1]} : vector<16x128xf32> to vector<1x128xf32>
    %77 = vector.extract_strided_slice %25 {offsets = [5, 0], sizes = [1, 128], strides = [1, 1]} : vector<16x128xf32> to vector<1x128xf32>
    %78 = vector.extract_strided_slice %25 {offsets = [6, 0], sizes = [1, 128], strides = [1, 1]} : vector<16x128xf32> to vector<1x128xf32>
    %79 = vector.extract_strided_slice %25 {offsets = [7, 0], sizes = [1, 128], strides = [1, 1]} : vector<16x128xf32> to vector<1x128xf32>
    %cst_19 = arith.constant 5.000000e-01 : f32
    %80 = vector.broadcast %cst_19 : f32 to vector<1x128xf32>
    %81 = arith.mulf %80, %74 : vector<1x128xf32>
    %82 = arith.subf %72, %81 : vector<1x128xf32>
    %cst_20 = arith.constant 5.000000e-01 : f32
    %83 = vector.broadcast %cst_20 : f32 to vector<1x128xf32>
    %84 = arith.mulf %83, %75 : vector<1x128xf32>
    %85 = arith.subf %73, %84 : vector<1x128xf32>
    %cst_21 = arith.constant 5.000000e-01 : f32
    %86 = vector.broadcast %cst_21 : f32 to vector<1x128xf32>
    %87 = arith.mulf %86, %74 : vector<1x128xf32>
    %88 = arith.addf %72, %87 : vector<1x128xf32>
    %cst_22 = arith.constant 5.000000e-01 : f32
    %89 = vector.broadcast %cst_22 : f32 to vector<1x128xf32>
    %90 = arith.mulf %89, %75 : vector<1x128xf32>
    %91 = arith.addf %73, %90 : vector<1x128xf32>
    %cst_23 = arith.constant 5.000000e-01 : f32
    %92 = vector.broadcast %cst_23 : f32 to vector<1x128xf32>
    %93 = arith.mulf %92, %78 : vector<1x128xf32>
    %94 = arith.subf %76, %93 : vector<1x128xf32>
    %cst_24 = arith.constant 5.000000e-01 : f32
    %95 = vector.broadcast %cst_24 : f32 to vector<1x128xf32>
    %96 = arith.mulf %95, %79 : vector<1x128xf32>
    %97 = arith.subf %77, %96 : vector<1x128xf32>
    %cst_25 = arith.constant 5.000000e-01 : f32
    %98 = vector.broadcast %cst_25 : f32 to vector<1x128xf32>
    %99 = arith.mulf %98, %78 : vector<1x128xf32>
    %100 = arith.addf %76, %99 : vector<1x128xf32>
    %cst_26 = arith.constant 5.000000e-01 : f32
    %101 = vector.broadcast %cst_26 : f32 to vector<1x128xf32>
    %102 = arith.mulf %101, %79 : vector<1x128xf32>
    %103 = arith.addf %77, %102 : vector<1x128xf32>
    %104 = arith.subf %88, %82 : vector<1x128xf32>
    %105 = arith.subf %91, %85 : vector<1x128xf32>
    %106 = arith.mulf %104, %105 : vector<1x128xf32>
    %107 = arith.subf %100, %94 : vector<1x128xf32>
    %108 = arith.subf %103, %97 : vector<1x128xf32>
    %109 = arith.mulf %107, %108 : vector<1x128xf32>
    %110 = arith.minimumf %88, %100 : vector<1x128xf32>
    %111 = arith.maximumf %82, %94 : vector<1x128xf32>
    %112 = arith.subf %110, %111 : vector<1x128xf32>
    %cst_27 = arith.constant 0.000000e+00 : f32
    %113 = vector.broadcast %cst_27 : f32 to vector<1x128xf32>
    %114 = arith.maximumf %112, %113 : vector<1x128xf32>
    %115 = arith.minimumf %91, %103 : vector<1x128xf32>
    %116 = arith.maximumf %85, %97 : vector<1x128xf32>
    %117 = arith.subf %115, %116 : vector<1x128xf32>
    %cst_28 = arith.constant 0.000000e+00 : f32
    %118 = vector.broadcast %cst_28 : f32 to vector<1x128xf32>
    %119 = arith.maximumf %117, %118 : vector<1x128xf32>
    %120 = arith.mulf %114, %119 : vector<1x128xf32>
    %121 = arith.addf %106, %109 : vector<1x128xf32>
    %122 = arith.subf %121, %120 : vector<1x128xf32>
    %123 = arith.divf %120, %122 : vector<1x128xf32>
    %124 = arith.maximumf %88, %100 : vector<1x128xf32>
    %125 = arith.minimumf %82, %94 : vector<1x128xf32>
    %126 = arith.subf %124, %125 : vector<1x128xf32>
    %127 = arith.maximumf %91, %103 : vector<1x128xf32>
    %128 = arith.minimumf %85, %97 : vector<1x128xf32>
    %129 = arith.subf %127, %128 : vector<1x128xf32>
    %130 = arith.mulf %126, %129 : vector<1x128xf32>
    %131 = arith.subf %130, %122 : vector<1x128xf32>
    %132 = arith.divf %131, %130 : vector<1x128xf32>
    %133 = arith.subf %123, %132 : vector<1x128xf32>
    %cst_29 = arith.constant 1.000000e+00 : f32
    %134 = vector.broadcast %cst_29 : f32 to vector<1x128xf32>
    %135 = arith.subf %134, %133 : vector<1x128xf32>
    %136 = vector.shape_cast %135 : vector<1x128xf32> to vector<1x1x128xf32>
    %cst_30 = arith.constant dense<0.000000e+00> : vector<1xf32>
    %137 = vector.multi_reduction <add>, %136, %cst_30 [1, 2] : vector<1x1x128xf32> to vector<1xf32>
    %138 = vector.shape_cast %137 : vector<1xf32> to vector<1x1x1xf32>
    %139 = vector.extract %138[0, 0, 0] : f32 from vector<1x1x1xf32>
    %140 = tpu.iota {dimensions = array<i32: 0>} : vector<8x128xi32>
    %141 = tpu.iota {dimensions = array<i32: 1>} : vector<8x128xi32>
    %c0_i32 = arith.constant 0 : i32
    %142 = vector.broadcast %c0_i32 : i32 to vector<8x128xi32>
    %143 = arith.cmpi eq, %140, %142 : vector<8x128xi32>
    %c0_i32_31 = arith.constant 0 : i32
    %144 = vector.broadcast %c0_i32_31 : i32 to vector<8x128xi32>
    %145 = arith.cmpi eq, %141, %144 : vector<8x128xi32>
    %146 = arith.andi %143, %145 : vector<8x128xi1>
    %cst_32 = arith.constant 0.000000e+00 : f32
    %147 = vector.broadcast %63 : f32 to vector<8x128xf32>
    %148 = vector.broadcast %cst_32 : f32 to vector<8x128xf32>
    %149 = arith.select %146, %147, %148 : vector<8x128xi1>, vector<8x128xf32>
    %c1_i32 = arith.constant 1 : i32
    %150 = vector.broadcast %c1_i32 : i32 to vector<8x128xi32>
    %151 = arith.cmpi eq, %141, %150 : vector<8x128xi32>
    %152 = arith.andi %143, %151 : vector<8x128xi1>
    %153 = vector.broadcast %71 : f32 to vector<8x128xf32>
    %154 = arith.select %152, %153, %149 : vector<8x128xi1>, vector<8x128xf32>
    %c2_i32 = arith.constant 2 : i32
    %155 = vector.broadcast %c2_i32 : i32 to vector<8x128xi32>
    %156 = arith.cmpi eq, %141, %155 : vector<8x128xi32>
    %157 = arith.andi %143, %156 : vector<8x128xi1>
    %158 = vector.broadcast %139 : f32 to vector<8x128xf32>
    %159 = arith.select %157, %158, %154 : vector<8x128xi1>, vector<8x128xf32>
    %c0_33 = arith.constant 0 : index
    %c0_34 = arith.constant 0 : index
    %160 = vector.load %arg2[%c0_33, %c0_34] : memref<8x128xf32, #tpu.memory_space<vmem>>, vector<8x128xf32>
    tpu.vector_store %arg2[%c0_33, %c0_34], %159 {strides = array<i32>} : memref<8x128xf32, #tpu.memory_space<vmem>>, vector<8x128xf32>,
    return
  }
}

</mosaic_0001>

<bundles_post_ra>
// kernel: tpu_custom_call.1
= control target key start
LH: loop header
LB: loop body
LE: loop exit
PB: predicated region body
PF: predicated region fallthrough
CT: control target
= control target key end

     0   :  { %7 = vsyncpa [#allocation3], 0  ;;  %s552_s0 = inlined_call_operand.hbm [shape: f32[4,128], index: 0, kind: input, shape index: {}]   ;;  %s553_s1 = inlined_call_operand.hbm [shape: f32[16,128], index: 1, kind: input, shape index: {}]   ;;  %s554_s2 = inlined_call_operand.hbm [shape: f32[8,128], index: 2, kind: output, shape index: {}]  }
   0x1   :  { %8 = vsyncpa [#allocation6], 0 }
   0x2   :  { %9 = vsyncpa [#allocation4], 0  ;;  %s15_s11 = sshll.u32 %s552_s0, 4  ;;  %s394_s12 = smov [#allocation2]   ;;  %s16_s11 = int_to_ptr.hbm [resolvable:$true] %s15_s11 }
   0x3   :  { %s17_s13 = sshll.u32 %s394_s12, 4  ;;  %s25_s16 = sshll.u32 %s553_s1, 4  ;;  %s18_s13 = int_to_ptr.vmem [resolvable:$true] %s17_s13  ;;  %s26_s16 = int_to_ptr.hbm [resolvable:$true] %s25_s16 }
   0x4   :  { %20 = dma.hbm_to_vmem [thread:$0]  %s16_s11, 64, %s18_s13, [#allocation3]  }
   0x5   :  { %s395_s17 = smov [#allocation5]   ;;  %s396_s19 = smov 128  }
   0x6   :  { %s27_s18 = sshll.u32 %s395_s17, 4  ;;  %s397_s20 = smov 8   ;;  %s28_s18 = int_to_ptr.vmem [resolvable:$true] %s27_s18 }
   0x7   :  { %33 = dma.hbm_to_vmem [thread:$0]  %s26_s16, 256, %s28_s18, [#allocation6], %s396_s19, %s396_s19, %s397_s20  }
   0x8   :  { %388 = dma.done.wait [#allocation3], 64  }
   0x9   :  { %389 = vsyncadd [#allocation3], 4294967232 }
   0xa   :  { %390 = dma.done.wait [#allocation6], 256  }
   0xb   :  { %391 = vsyncadd [#allocation6], 4294967040  ;;  %v91_v0 = vld [vmem:[#allocation5] sm:$0xff]  ;;  %v420_v1 = vld [vmem:[#allocation2] sm:$0xf]  ;;  %vm80_vm0 = vcmask 1043456  }
   0xc   :  { %v422_v2 = vld [vmem:[#allocation5 + $0x8] sm:$0xff]  ;;  %v157_v3 = vrot.slane %v91_v0, 4  ;;  %v171_v4 = vmul.f32 0.5, %v91_v0  ;;  %v43_v5 = vand.u32 2147483647, %v420_v1  ;;  %vm72_vm1 = vcmp.ge.f32.partialorder %v420_v1, 0.0 }
   0xd   :  { %v93_v6 = vand.u32 2147483647, %v422_v2  ;;  %vm122_vm2 = vcmp.ge.f32.partialorder %v422_v2, 0.0  ;;  %s276_s23 = sshll.u32 %s554_s2, 4  ;;  %s398_s27 = smov [#allocation7]   ;;  %s277_s23 = int_to_ptr.hbm [resolvable:$true] %s276_s23 }
   0xe   :  { %v159_v7 = vsub.f32 %v91_v0, %v157_v3  ;;  %v173_v8 = vrot.slane %v171_v4, 2  ;;  %v44_v9 = vsub.f32 0.0, %v43_v5  ;;  %v75_v52 = vsel %vm72_vm1, %v43_v5, 0.0  ;;  %s274_s28 = sshll.u32 %s398_s27, 4  ;;  %s275_s28 = int_to_ptr.vmem [resolvable:$true] %s274_s28 }
   0xf   :  { %v94_v10 = vsub.f32 0.0, %v93_v6  ;;  %v126_v53 = vsel %vm122_vm2, 0.0, %v93_v6  ;;  %v128_v54 = vsel %vm122_vm2, %v93_v6, 0.0 }
  0x10   :  { %v160_v11 = vand.u32 2147483647, %v159_v7  ;;  %v175_v12 = vsub.f32 %v91_v0, %v173_v8  ;;  %v176_v13 = vadd.f32 %v173_v8, %v91_v0  ;;  %v45_v14 = vmul.f32 1.442695, %v44_v9 }
  0x11   :  { %v95_v15 = vmul.f32 1.442695, %v94_v10 }
  0x12   :  { %v161_v16 = vsel %vm80_vm0, %v160_v11, 0.0  ;;  %300 = vpow2.f32 %v45_v14  ;;  %v177_v17 = vsub.f32 %v176_v13, %v175_v12  ;;  %v183_v18 = vrot.slane %v176_v13, 4 }
  0x13   :  { %162 = vadd.xlane.f32.xlu1 %v161_v16  ;;  %v187_v19 = vrot.slane %v175_v12, 4  ;;  %302 = vpow2.f32 %v95_v15 }
  0x14   :  { %v179_v20 = vrot.slane %v177_v17, 1  ;;  %v185_v21 = vmin.f32 %v176_v13, %v183_v18  ;;  %v216_v22 = vmax.f32 %v176_v13, %v183_v18 }
  0x15   :  { %v189_v23 = vmax.f32 %v175_v12, %v187_v19  ;;  %v217_v24 = vmin.f32 %v175_v12, %v187_v19 }
  0x16   :  { %v181_v25 = vmul.f32 %v179_v20, %v177_v17 }
  0x17   :  { %v190_v26 = vsub.f32 %v185_v21, %v189_v23  ;;  %v218_v27 = vsub.f32 %v216_v22, %v217_v24 }
  0x18   :  { %v427_v28 = vpop.eup %300  ;;  %v197_v29 = vrot.slane %v181_v25, 4 }
  0x19   :  { %v429_v30 = vpop.eup %302  ;;  %v47_v31 = vadd.f32 1.0, %v427_v28  ;;  %v191_v32 = vmax.f32 %v190_v26, 0.0  ;;  %v50_v33 = vmul.f32 -0.5, %v427_v28  ;;  %v220_v34 = vrot.slane %v218_v27, 1 }
  0x1a   :  { %v434_v35 = vadd.f32 1.0, %v429_v30  ;;  %v100_v36 = vmul.f32 -0.5, %v429_v30  ;;  %v199_v38 = vadd.f32 %v197_v29, %v181_v25  ;;  %v53_v39 = vand.u32 2147483647, %v427_v28 }
  0x1b   :  { %304 = vlog2.f32 %v47_v31  ;;  %v193_v37 = vrot.slane %v191_v32, 1  ;;  %v439_v40 = vmul.f32 %v220_v34, %v218_v27  ;;  %v51_v41 = vadd.f32 1.0, %v50_v33 }
  0x1c   :  { %306 = vrcp.f32 %v47_v31  ;;  %v66_v42 = vand.u32 2147483647, %v47_v31  ;;  %v68_v44 = vand.u32 2147483648, %v47_v31  ;;  %v101_v45 = vadd.f32 1.0, %v100_v36 }
  0x1d   :  { %308 = vlog2.f32 %v434_v35  ;;  %v442_v43 = vmul.f32 %v193_v37, %v191_v32  ;;  %v103_v46 = vand.u32 2147483647, %v429_v30  ;;  %v233_v48 = vand.u32 2147483647, %v439_v40 }
  0x1e   :  { %310 = vrcp.f32 %v439_v40  ;;  %v235_v49 = vand.u32 2147483648, %v439_v40  ;;  %vm453_vm3 = vcmp.lt.f32.partialorder %v53_v39, 0.0004427343  ;;  %v52_v56 = vmul.f32 %v427_v28, %v51_v41 }
  0x1f   :  { %v448_v47 = vsub.f32 %v199_v38, %v442_v43  ;;  %312 = vrcp.f32 %v434_v35  ;;  %vm62_vm4 = vweird.f32 %v47_v31  ;;  %vm464_vm5 = vcmp.eq.f32.partialorder %v66_v42, 8.507059e+37 }
  0x20   :  { %v69_v61 = vor.u32 1.1754944e-38, %v68_v44  ;;  %vm229_vm6 = vweird.f32 %v439_v40  ;;  %vm470_vm7 = vcmp.eq.f32.partialorder %v233_v48, 8.507059e+37  ;;  %v236_v63 = vor.u32 1.1754944e-38, %v235_v49 }
  0x21   :  { %v305_v50 = vpop.eup %304  ;;  %314 = vrcp.f32 %v448_v47  ;;  %v102_v0 = vmul.f32 %v429_v30, %v101_v45  ;;  %vm475_vm8 = vcmp.lt.f32.partialorder %v103_v46, 0.0004427343  ;;  %vm112_vm10 = vweird.f32 %v434_v35 }
  0x22   :  { %v307_v55 = vpop.eup %306  ;;  %v49_v59 = vmul.f32 0.6931472, %v305_v50  ;;  %v116_v6 = vand.u32 2147483647, %v434_v35  ;;  %vm206_vm11 = vweird.f32 %v448_v47  ;;  %v210_v8 = vand.u32 2147483647, %v448_v47 }
  0x23   :  { %v309_v58 = vpop.eup %308  ;;  %v58_v60 = vmul.f32 %v307_v55, %v47_v31  ;;  %vm63_vm9 = vweird.f32 %v307_v55  ;;  %v212_v13 = vand.u32 2147483648, %v448_v47  ;;  %v223_v17 = vsub.f32 %v439_v40, %v448_v47 }
  0x24   :  { %v311_v4 = vpop.eup %310  ;;  %v99_v10 = vmul.f32 0.6931472, %v309_v58  ;;  %v55_v11 = vsel %vm453_vm3, %v52_v56, %v49_v59  ;;  %vm489_vm12 = vmor %vm62_vm4, %vm63_vm9  ;;  %v118_v19 = vand.u32 2147483648, %v434_v35  ;;  %vm497_vm15 = vcmp.eq.f32.partialorder %v210_v8, 8.507059e+37 }
  0x25   :  { %v59_v5 = vsub.f32 1.0, %v58_v60  ;;  %v313_v7 = vpop.eup %312  ;;  %v225_v9 = vmul.f32 %v311_v4, %v439_v40  ;;  %vm230_vm13 = vweird.f32 %v311_v4  ;;  %v76_v23 = vadd.f32 %v75_v52, %v55_v11 }
  0x26   :  { %v108_v14 = vmul.f32 %v313_v7, %v434_v35  ;;  %vm113_vm14 = vweird.f32 %v313_v7  ;;  %v105_v26 = vsel %vm475_vm8, %v102_v0, %v99_v10  ;;  %vm507_vm4 = vmor %vm229_vm6, %vm230_vm13  ;;  %vm519_vm8 = vcmp.eq.f32.partialorder %v116_v6, 8.507059e+37 }
  0x27   :  { %v60_v12 = vmul.f32 %v307_v55, %v59_v5  ;;  %v315_v15 = vpop.eup %314  ;;  %v226_v18 = vsub.f32 1.0, %v225_v9  ;;  %vm515_vm9 = vmor %vm112_vm10, %vm113_vm14  ;;  %v119_v38 = vor.u32 1.1754944e-38, %v118_v19  ;;  %v213_v41 = vor.u32 1.1754944e-38, %v212_v13 }
  0x28   :  { %v202_v21 = vmul.f32 %v315_v15, %v448_v47  ;;  %v109_v22 = vsub.f32 1.0, %v108_v14  ;;  %vm207_vm3 = vweird.f32 %v315_v15  ;;  %v77_v44 = vmul.f32 0.75, %v76_v23 }
  0x29   :  { %v61_v20 = vadd.f32 %v307_v55, %v60_v12  ;;  %v227_v25 = vmul.f32 %v311_v4, %v226_v18  ;;  %v127_v45 = vadd.f32 %v126_v53, %v105_v26  ;;  %v129_v46 = vadd.f32 %v128_v54, %v105_v26 }
  0x2a   :  { %v203_v29 = vsub.f32 1.0, %v202_v21  ;;  %v110_v32 = vmul.f32 %v313_v7, %v109_v22 }
  0x2b   :  { %v65_v27 = vsel %vm489_vm12, %v307_v55, %v61_v20  ;;  %v228_v34 = vadd.f32 %v311_v4, %v227_v25  ;;  %v130_v54 = vmul.f32 0.25, %v127_v45  ;;  %v133_v57 = vmul.f32 0.75, %v129_v46 }
  0x2c   :  { %v70_v33 = vsel %vm464_vm5, %v69_v61, %v65_v27  ;;  %v204_v40 = vmul.f32 %v315_v15, %v203_v29  ;;  %v111_v42 = vadd.f32 %v313_v7, %v110_v32  ;;  %vm208_vm5 = vmor %vm206_vm11, %vm207_vm3 }
  0x2d   :  { %v73_v39 = vmul.f32 %v427_v28, %v70_v33  ;;  %v232_v35 = vsel %vm507_vm4, %v311_v4, %v228_v34 }
  0x2e   :  { %v205_v49 = vadd.f32 %v315_v15, %v204_v40  ;;  %v237_v50 = vsel %vm470_vm7, %v236_v63, %v232_v35  ;;  %v115_v28 = vsel %vm515_vm9, %v313_v7, %v111_v42  ;;  %v251_v40 = vlaneseq }
  0x2f   :  { %v74_v48 = vsel %vm72_vm1, %v70_v33, %v73_v39  ;;  %v120_v47 = vsel %vm519_vm8, %v119_v38, %v115_v28  ;;  %v238_v55 = vmul.f32 %v237_v50, %v223_v17  ;;  %vm144_vm1 = vcmask 1040384  }
  0x30   :  { %v78_v51 = vmul.f32 %v74_v48, %v74_v48  ;;  %v209_v52 = vsel %vm208_vm5, %v315_v15, %v205_v49  ;;  %v123_v56 = vmul.f32 %v429_v30, %v120_v47  ;;  %v254_v42 = vand.u32 127, %v251_v40 }
  0x31   :  { %v214_v1 = vsel %vm497_vm15, %v213_v41, %v209_v52  ;;  %v252_v41 = vshrl.u32 %v251_v40, 7 }
  0x32   :  { %v79_v53 = vmul.f32 %v78_v51, %v77_v44  ;;  %v215_v58 = vmul.f32 %v214_v1, %v442_v43  ;;  %v124_v59 = vsel %vm122_vm2, %v120_v47, %v123_v56  ;;  %v125_v60 = vsel %vm122_vm2, %v123_v56, %v120_v47 }
  0x33   :  { %v131_v62 = vmul.f32 %v125_v60, %v125_v60  ;;  %v134_v63 = vmul.f32 %v124_v59, %v124_v59  ;;  %vm256_vm2 = vcmp.eq.s32.totalorder %v254_v42, 0  ;;  %vm260_vm6 = vcmp.eq.s32.totalorder %v254_v42, 1 }
  0x34   :  { %v81_v61 = vsel %vm80_vm0, %v79_v53, 0.0  ;;  %v239_v30 = vsub.f32 %v215_v58, %v238_v55  ;;  %vm255_vm0 = vcmp.eq.s32.totalorder %v252_v41, 0  ;;  %vm264_vm7 = vcmp.eq.s32.totalorder %v254_v42, 2 }
  0x35   :  { %82 = vadd.xlane.f32.xlu0 %v81_v61  ;;  %v132_v0 = vmul.f32 %v131_v62, %v130_v54  ;;  %v135_v3 = vmul.f32 %v134_v63, %v133_v57  ;;  %vm257_vm10 = vmand %vm255_vm0, %vm256_vm2 }
  0x36   :  { %v240_v4 = vsub.f32 1.0, %v239_v30  ;;  %vm261_vm11 = vmand %vm255_vm0, %vm260_vm6 }
  0x37   :  { %v136_v5 = vsub.f32 %v132_v0, %v135_v3  ;;  %vm265_vm12 = vmand %vm255_vm0, %vm264_vm7 }
  0x38   :  { %v241_v6 = vsel %vm144_vm1, %v240_v4, 0.0 }
  0x39   :  { %242 = vadd.xlane.f32.xlu1 %v241_v6  ;;  %v138_v43 = vrot.slane %v136_v5, 7 }
  0x3b   :  { %v140_v7 = vmul.f32 %v138_v43, %v422_v2 }
  0x3d   :  { %v142_v8 = vrot.slane %v140_v7, 1 }
  0x3f   :  { %v145_v9 = vsel %vm144_vm1, %v142_v8, 0.0 }
  0x40   :  { %146 = vadd.xlane.f32.xlu0 %v145_v9 }
  0x86   :  { %v163_v10 = vpop.xlane.xlu1 %162 }
  0x87   :  { %v164_v14 = vrot.slane %v163_v10, 4 }
  0x89   :  { %v165_v19 = vadd.f32 %v164_v14, %v163_v10 }
  0x8b   :  { %v166_v23 = vrot.slane %v165_v19, 2 }
  0x8d   :  { %v167_v27 = vadd.f32 %v166_v23, %v165_v19 }
  0x8f   :  { %v168_v33 = vrot.slane %v167_v27, 1 }
  0x91   :  { %v169_v38 = vadd.f32 %v168_v33, %v167_v27 }
  0xa8   :  { %v83_v11 = vpop.xlane.xlu0 %82 }
  0xa9   :  { %v84_v12 = vrot.slane %v83_v11, 4 }
  0xab   :  { %v85_v13 = vadd.f32 %v84_v12, %v83_v11 }
  0xac   :  { %v243_v16 = vpop.xlane.xlu1 %242 }
  0xad   :  { %v86_v15 = vrot.slane %v85_v13, 2  ;;  %v244_v17 = vrot.slane %v243_v16, 4 }
  0xaf   :  { %v87_v18 = vadd.f32 %v86_v15, %v85_v13  ;;  %v245_v20 = vadd.f32 %v244_v17, %v243_v16 }
  0xb1   :  { %v88_v21 = vrot.slane %v87_v18, 1  ;;  %v246_v25 = vrot.slane %v245_v20, 2 }
  0xb3   :  { %v89_v22 = vadd.f32 %v88_v21, %v87_v18  ;;  %v147_v24 = vpop.xlane.xlu0 %146  ;;  %v247_v29 = vadd.f32 %v246_v25, %v245_v20 }
  0xb4   :  { %v148_v2 = vrot.slane %v147_v24, 4 }
  0xb5   :  { %287 = vpush %v89_v22  ;;  %v248_v36 = vrot.slane %v247_v29, 1 }
  0xb6   :  { %v149_v26 = vadd.f32 %v148_v2, %v147_v24 }
  0xb7   :  { %v249_v39 = vadd.f32 %v248_v36, %v247_v29 }
  0xb8   :  { %v150_v31 = vrot.slane %v149_v26, 2 }
  0xba   :  { %v151_v32 = vadd.f32 %v150_v31, %v149_v26 }
  0xbc   :  { %v152_v34 = vrot.slane %v151_v32, 1 }
  0xbe   :  { %v153_v37 = vadd.f32 %v152_v34, %v151_v32 }
  0xc0   :  { %289 = vpush %v153_v37 }
  0xc1   :  { %291 = vpush %v169_v38 }
  0xc2   :  { %293 = vpush %v249_v39 }
  0xe6   :  { %s288_s0 = spop %287 }
  0xf1   :  { %s290_s1 = spop %289 }
  0xf2   :  { %s155_s24 = sadd.f32 %s290_s1, %s288_s0  ;;  %s292_s25 = spop %291 }
  0xf3   :  { %s294_s26 = spop %293  ;;  %v262_v45 = vstv %s292_s25 }
  0xf4   :  { %v258_v44 = vstv %s155_s24  ;;  %v266_v48 = vstv %s294_s26 }
  0xf5   :  { %v259_v35 = vsel %vm257_vm10, %v258_v44, 0.0 }
  0xf6   :  { %v263_v46 = vsel %vm261_vm11, %v262_v45, %v259_v35 }
  0xf7   :  { %v267_v49 = vsel %vm265_vm12, %v266_v48, %v263_v46 }
  0xf8   :  { %268 = vst [vmem:[#allocation7] sm:$0xff] %v267_v49 }
  0xf9   :  { %279 = dma.vmem_to_hbm [thread:$0]  %s275_s28, 128, %s277_s23, [#allocation4]  }
  0xfa   :  { %392 = dma.done.wait [#allocation4], 128  }
  0xfb   :  { %393 = vsyncadd [#allocation4], 4294967168 }
  0xfc   :  { %284 = vsyncpa [#allocation3], 1 }
  0xfd   :  { %285 = vsyncpa [#allocation6], 1 }
  0xfe   :  { %286 = vsyncpa [#allocation4], 1 }

</bundles_post_ra>
